<compile_context>
chip_gen: v7x
topology: tpu7x:2x2x1
jax: 0.10.0
libtpu: 0.0.40
codegen_flags: <defaults>
</compile_context>

<pallas_src>
import functools

import jax
import jax.numpy as jnp
from jax.experimental import pallas as pl
from jax.experimental.pallas import tpu as pltpu


def actor_kernel(x_ref, w1_ref, w2_ref, wh_ref, b_ref, out_ref, *, h1, h2, A):
    x = x_ref[...]

    # Static lane-slices of the packed bias vector (1, h1 + h2 + 2A).
    b1 = b_ref[:, 0:h1]
    b2 = b_ref[:, h1:h1 + h2]
    bh = b_ref[:, h1 + h2:h1 + h2 + 2 * A]

    # linear1 + ReLU
    a1 = jnp.dot(x, w1_ref[...], preferred_element_type=jnp.float32) + b1
    a1 = jnp.maximum(a1, 0.0)

    # linear2 + ReLU
    a2 = jnp.dot(a1, w2_ref[...], preferred_element_type=jnp.float32) + b2
    a2 = jnp.maximum(a2, 0.0)

    # Fused heads: columns [:A] = mean, columns [A:] = log_std.
    head = jnp.dot(a2, wh_ref[...], preferred_element_type=jnp.float32) + bh

    # One lane-dense store: mean in the first A lanes, std = exp(log_std)
    # in the last A lanes.
    col = jax.lax.broadcasted_iota(jnp.int32, head.shape, 1)
    out_ref[...] = jnp.where(col < A, head, jnp.exp(head))
    # TODO(synk): torch.distributions.Normal has no Pallas equivalent; the
    # kernel returns the (mean, std) parameter pair instead.


def _round_up(x, m):
    return (x + m - 1) // m * m


def actor_forward(state, params, *, block_b=512):
    """Run the Actor forward pass. Returns (mean, std) of the Normal dist."""
    (w1, b1, w2, b2, wm, bm, ws, bs) = params
    B, num_states = state.shape
    h1 = w1.shape[1]
    h2 = w2.shape[1]
    A = wm.shape[1]

    # Fuse the two heads and pack all biases into a single vector.
    w_head = jnp.concatenate([wm, ws], axis=1)              # (h2, 2A)
    b_packed = jnp.concatenate([b1, b2, bm, bs], axis=1)    # (1, h1 + h2 + 2A)

    # Batch tile: multiple of 8 sublanes; pad B so the grid divides evenly.
    B8 = _round_up(B, 8)
    TB = min(block_b, B8)
    B_pad = _round_up(B8, TB)
    if B_pad != B:
        state = jnp.pad(state, ((0, B_pad - B), (0, 0)))

    kernel = functools.partial(actor_kernel, h1=h1, h2=h2, A=A)

    out = pl.pallas_call(
        kernel,
        grid=(B_pad // TB,),
        out_shape=jax.ShapeDtypeStruct((B_pad, 2 * A), jnp.float32),
        in_specs=[
            # state tiles march along the batch; weights/bias stay resident.
            pl.BlockSpec((TB, num_states), lambda i: (i, 0)),
            pl.BlockSpec(w1.shape, lambda i: (0, 0)),
            pl.BlockSpec(w2.shape, lambda i: (0, 0)),
            pl.BlockSpec(w_head.shape, lambda i: (0, 0)),
            pl.BlockSpec(b_packed.shape, lambda i: (0, 0)),
        ],
        out_specs=pl.BlockSpec((TB, 2 * A), lambda i: (i, 0)),
        compiler_params=pltpu.CompilerParams(
            dimension_semantics=("parallel",)),
    )(state, w1, w2, w_head, b_packed)

    out = out[:B]
    mean = out[:, :A]
    std = out[:, A:]
    return mean, std


def init_actor_params(key, num_states, num_actions, h1, h2):
    """Deterministic init mimicking nn.Linear's U(-1/sqrt(fan_in), 1/sqrt(fan_in))."""
    def linear(k, fan_in, fan_out):
        kw, kb = jax.random.split(k)
        bound = 1.0 / jnp.sqrt(jnp.float32(fan_in))
        w = jax.random.uniform(kw, (fan_in, fan_out), jnp.float32, -bound, bound)
        b = jax.random.uniform(kb, (1, fan_out), jnp.float32, -bound, bound)
        return w, b

    k1, k2, k3, k4 = jax.random.split(key, 4)
    w1, b1 = linear(k1, num_states, h1)
    w2, b2 = linear(k2, h1, h2)
    wm, bm = linear(k3, h2, num_actions)
    ws, bs = linear(k4, h2, num_actions)
    return (w1, b1, w2, b2, wm, bm, ws, bs)


def actor_forward_ref(state, params):
    """Pure-JAX reference of the same forward pass."""
    (w1, b1, w2, b2, wm, bm, ws, bs) = params
    h = jnp.maximum(state @ w1 + b1, 0.0)
    h = jnp.maximum(h @ w2 + b2, 0.0)
    mean = h @ wm + bm
    std = jnp.exp(h @ ws + bs)
    return mean, std


if __name__ == "__main__":
    num_states = 16
    num_actions = 8
    hiddenl1_size = 32
    hiddenl2_size = 32
    batch = 8

    key = jax.random.PRNGKey(0)
    k_params, k_state = jax.random.split(key)

    params = init_actor_params(k_params, num_states, num_actions,
                               hiddenl1_size, hiddenl2_size)
    state = jax.random.normal(k_state, (batch, num_states), jnp.float32)

    mean, std = actor_forward(state, params)
    jax.block_until_ready((mean, std))

    mean_ref, std_ref = actor_forward_ref(state, params)
    assert jnp.allclose(mean, mean_ref, atol=1e-5, rtol=1e-5)
    assert jnp.allclose(std, std_ref, atol=1e-5, rtol=1e-5)

    print("KERNEL_OK")
</pallas_src>

<mosaic_0001>
module attributes {stable_mosaic.version = 11 : i64} {
  func.func @actor_kernel(%arg0: i32, %arg1: memref<8x16xf32, #tpu.memory_space<vmem>>, %arg2: memref<16x32xf32, #tpu.memory_space<vmem>>, %arg3: memref<32x32xf32, #tpu.memory_space<vmem>>, %arg4: memref<32x16xf32, #tpu.memory_space<vmem>>, %arg5: memref<1x80xf32, #tpu.memory_space<vmem>>, %arg6: memref<8x16xf32, #tpu.memory_space<vmem>>) attributes {dimension_semantics = [#tpu.dimension_semantics<parallel>], iteration_bounds = array<i64: 1>, scalar_prefetch = 0 : i64, scratch_operands = 0 : i64, tpu.core_type = #tpu.core_type<tc>, window_params = [{transform_indices = @transform_0, window_bounds = array<i64: 8, 16>}, {pipeline_mode = #tpu.pipeline_mode<synchronous>, transform_indices = @transform_1, window_bounds = array<i64: 16, 32>}, {pipeline_mode = #tpu.pipeline_mode<synchronous>, transform_indices = @transform_2, window_bounds = array<i64: 32, 32>}, {pipeline_mode = #tpu.pipeline_mode<synchronous>, transform_indices = @transform_3, window_bounds = array<i64: 32, 16>}, {pipeline_mode = #tpu.pipeline_mode<synchronous>, transform_indices = @transform_4, window_bounds = array<i64: 1, 80>}, {transform_indices = @transform_5, window_bounds = array<i64: 8, 16>}]} {
    %c0 = arith.constant 0 : index
    %c0_0 = arith.constant 0 : index
    %0 = vector.load %arg1[%c0, %c0_0] : memref<8x16xf32, #tpu.memory_space<vmem>>, vector<8x16xf32>
    %c0_1 = arith.constant 0 : index
    %c0_2 = arith.constant 0 : index
    %1 = vector.load %arg5[%c0_1, %c0_2] : memref<1x80xf32, #tpu.memory_space<vmem>>, vector<1x32xf32>
    %c0_3 = arith.constant 0 : index
    %c32 = arith.constant 32 : index
    %2 = vector.load %arg5[%c0_3, %c32] : memref<1x80xf32, #tpu.memory_space<vmem>>, vector<1x32xf32>
    %c0_4 = arith.constant 0 : index
    %c64 = arith.constant 64 : index
    %3 = vector.load %arg5[%c0_4, %c64] : memref<1x80xf32, #tpu.memory_space<vmem>>, vector<1x16xf32>
    %c0_5 = arith.constant 0 : index
    %c0_6 = arith.constant 0 : index
    %4 = vector.load %arg2[%c0_5, %c0_6] : memref<16x32xf32, #tpu.memory_space<vmem>>, vector<16x32xf32>
    %cst = arith.constant dense<0.000000e+00> : vector<8x32xf32>
    %5 = tpu.matmul %0, %4, %cst {dimension_numbers = #tpu.dot_dimension_numbers<[1], [0], [0], [1], [0, 0, 1, 1], [], []>} : vector<8x16xf32>, vector<16x32xf32>, vector<8x32xf32> -> vector<8x32xf32>
    %6 = vector.broadcast %1 : vector<1x32xf32> to vector<8x32xf32>
    %7 = arith.addf %5, %6 : vector<8x32xf32>
    %cst_7 = arith.constant 0.000000e+00 : f32
    %8 = vector.broadcast %cst_7 : f32 to vector<8x32xf32>
    %9 = arith.maximumf %7, %8 : vector<8x32xf32>
    %c0_8 = arith.constant 0 : index
    %c0_9 = arith.constant 0 : index
    %10 = vector.load %arg3[%c0_8, %c0_9] : memref<32x32xf32, #tpu.memory_space<vmem>>, vector<32x32xf32>
    %cst_10 = arith.constant dense<0.000000e+00> : vector<8x32xf32>
    %11 = tpu.matmul %9, %10, %cst_10 {dimension_numbers = #tpu.dot_dimension_numbers<[1], [0], [0], [1], [0, 0, 1, 1], [], []>} : vector<8x32xf32>, vector<32x32xf32>, vector<8x32xf32> -> vector<8x32xf32>
    %12 = vector.broadcast %2 : vector<1x32xf32> to vector<8x32xf32>
    %13 = arith.addf %11, %12 : vector<8x32xf32>
    %cst_11 = arith.constant 0.000000e+00 : f32
    %14 = vector.broadcast %cst_11 : f32 to vector<8x32xf32>
    %15 = arith.maximumf %13, %14 : vector<8x32xf32>
    %c0_12 = arith.constant 0 : index
    %c0_13 = arith.constant 0 : index
    %16 = vector.load %arg4[%c0_12, %c0_13] : memref<32x16xf32, #tpu.memory_space<vmem>>, vector<32x16xf32>
    %cst_14 = arith.constant dense<0.000000e+00> : vector<8x16xf32>
    %17 = tpu.matmul %15, %16, %cst_14 {dimension_numbers = #tpu.dot_dimension_numbers<[1], [0], [0], [1], [0, 0, 1, 1], [], []>} : vector<8x32xf32>, vector<32x16xf32>, vector<8x16xf32> -> vector<8x16xf32>
    %18 = vector.broadcast %3 : vector<1x16xf32> to vector<8x16xf32>
    %19 = arith.addf %17, %18 : vector<8x16xf32>
    %20 = tpu.iota {dimensions = array<i32: 1>} : vector<8x16xi32>
    %c8_i32 = arith.constant 8 : i32
    %21 = vector.broadcast %c8_i32 : i32 to vector<8x16xi32>
    %22 = arith.cmpi slt, %20, %21 : vector<8x16xi32>
    %23 = math.exp %19 : vector<8x16xf32>
    %24 = arith.select %22, %19, %23 : vector<8x16xi1>, vector<8x16xf32>
    %c0_15 = arith.constant 0 : index
    %c0_16 = arith.constant 0 : index
    %25 = vector.load %arg6[%c0_15, %c0_16] : memref<8x16xf32, #tpu.memory_space<vmem>>, vector<8x16xf32>
    tpu.vector_store %arg6[%c0_15, %c0_16], %24 {strides = array<i32>} : memref<8x16xf32, #tpu.memory_space<vmem>>, vector<8x16xf32>,
    return
  }
  func.func @transform_0(%arg0: i32) -> (i32, i32) {
    %c0_i32 = arith.constant 0 : i32
    %c0_i32_0 = arith.constant 0 : i32
    return %arg0, %c0_i32 : i32, i32
  }
  func.func @transform_1(%arg0: i32) -> (i32, i32) {
    %c0_i32 = arith.constant 0 : i32
    %c0_i32_0 = arith.constant 0 : i32
    %c0_i32_1 = arith.constant 0 : i32
    return %c0_i32, %c0_i32_0 : i32, i32
  }
  func.func @transform_2(%arg0: i32) -> (i32, i32) {
    %c0_i32 = arith.constant 0 : i32
    %c0_i32_0 = arith.constant 0 : i32
    %c0_i32_1 = arith.constant 0 : i32
    return %c0_i32, %c0_i32_0 : i32, i32
  }
  func.func @transform_3(%arg0: i32) -> (i32, i32) {
    %c0_i32 = arith.constant 0 : i32
    %c0_i32_0 = arith.constant 0 : i32
    %c0_i32_1 = arith.constant 0 : i32
    return %c0_i32, %c0_i32_0 : i32, i32
  }
  func.func @transform_4(%arg0: i32) -> (i32, i32) {
    %c0_i32 = arith.constant 0 : i32
    %c0_i32_0 = arith.constant 0 : i32
    %c0_i32_1 = arith.constant 0 : i32
    return %c0_i32, %c0_i32_0 : i32, i32
  }
  func.func @transform_5(%arg0: i32) -> (i32, i32) {
    %c0_i32 = arith.constant 0 : i32
    %c0_i32_0 = arith.constant 0 : i32
    return %arg0, %c0_i32 : i32, i32
  }
}

</mosaic_0001>

<bundles_post_ra>
// kernel: tpu_custom_call.1
= control target key start
LH: loop header
LB: loop body
LE: loop exit
PB: predicated region body
PF: predicated region fallthrough
CT: control target
= control target key end

     0   :  { %10 = vsyncpa [#allocation3], 0  ;;  %s519_s0 = inlined_call_operand.hbm [shape: f32[8,16], index: 0, kind: input, shape index: {}]   ;;  %s520_s1 = inlined_call_operand.vmem [shape: f32[16,32], index: 1, kind: input, shape index: {}]   ;;  %s521_s2 = inlined_call_operand.vmem [shape: f32[32,32], index: 2, kind: input, shape index: {}]   ;;  %s522_s3 = inlined_call_operand.vmem [shape: f32[32,16], index: 3, kind: input, shape index: {}]   ;;  %s523_s4 = inlined_call_operand.vmem [shape: f32[1,80], index: 4, kind: input, shape index: {}]   ;;  %s524_s5 = inlined_call_operand.hbm [shape: f32[8,16], index: 5, kind: output, shape index: {}]  }
   0x1   :  { %11 = vsyncpa [#allocation4], 0  ;;  %s420_s18 = smov [#allocation2]   ;;  %s372_s22 = scalar_lea.hbm %s519_s0, 128 }
   0x2   :  { %s18_s19 = sshll.u32 %s420_s18, 4  ;;  %p373_p0 = scmp.ne.s32.totalorder %s519_s0, %s372_s22  ;;  %s19_s19 = int_to_ptr.vmem [resolvable:$true] %s18_s19 }
   0x3   :  { %p376_p1 = scmp.lt.u32.totalorder %s372_s22, %s519_s0 }
   0x5   :  { %p378_p2 = pnand %p376_p1, %p373_p0 }
   0x7   :  { %381 = shalt.err (!%p378_p2)
}
   0x8   :  { %s382_s27 = scalar_lea.vmem %s19_s19, 128  ;;  %p387_p4 = scmp.lt.s32.totalorder %s19_s19, %s19_s19 }
   0x9   :  { %p383_p3 = scmp.ne.s32.totalorder %s19_s19, %s382_s27  ;;  %p388_p5 = scmp.lt.s32.totalorder %s382_s27, %s382_s27 }
   0xb   :  { %p389_p6 = por %p388_p5, %p387_p4 }
   0xd   :  { %p390_p7 = pnand %p389_p6, %p383_p3 }
   0xf   :  { %393 = shalt.err (!%p390_p7)
}
  0x10   :  { %21 = dma.hbm_to_vmem [thread:$0]  %s519_s0, 128, %s19_s19, [#allocation3]  }
  0x11   :  { %416 = dma.done.wait [#allocation3], 128  }
  0x12   :  { %417 = vsyncadd [#allocation3], 4294967168  ;;  %v421_v0 = vmov 0.0|0.0   ;;  %vm422_vm0 = vmmov 0   ;;  %v423_v1 = vmov 0.0   ;;  %v35_v2 = vld [vmem:[%s520_s1] sm:$0xff]  ;;  %v280_v33 = vlaneseq }
  0x13   :  { %348 = vmatprep.subr.bf16.mxu0 %v421_v0  ;;  %323 = vmatprep.mubr.msk.f32.mxu0 %vm422_vm0, %v423_v1  ;;  %v36_v3 = vld [vmem:[%s520_s1 + $0x8] sm:$0xff]  ;;  %v118_v5 = vld [vmem:[%s521_s2] sm:$0xff]  ;;  %vm43_vm1 = vcmask 130048   ;;  %v120_v9 = vld [vmem:[%s521_s2 + $0x10] sm:$0xff]  ;;  %s424_s21 = smov 96   ;;  %vm125_vm2 = vcmask 261120  }
  0x14   :  { %351 = vmatprep.subr.bf16.mxu1 %v421_v0  ;;  %334 = vmatprep.mubr.msk.f32.mxu1 %vm422_vm0, %v423_v1  ;;  %v349_v4 = vpack.c.bf16 %v36_v3, %v35_v2  ;;  %v119_v6 = vld [vmem:[%s521_s2 + $0x8] sm:$0xff]  ;;  %v33_v8 = vld [vmem:[#allocation2] sm:$0xff]  ;;  %v121_v10 = vld [vmem:[%s521_s2 + $0x18] sm:$0xff]  ;;  %s425_s24 = smov 64   ;;  %v281_v34 = vand.u32 127, %v280_v33  ;;  %s426_s25 = smov [#allocation5]  }
  0x15   :  { %v352_v7 = vpack.c.bf16 %v119_v6, %v118_v5  ;;  %v355_v11 = vpack.c.bf16 %v121_v10, %v120_v9  ;;  %v302_v12 = vld [vmem:[%s523_s4] ss:$0 sm:$0xff]  ;;  %v201_v14 = vld [vmem:[%s522_s3 + $0x8] sm:$0xff]  ;;  %v202_v20 = vld [vmem:[%s522_s3 + $0x10] sm:$0xff] }
  0x16   :  { %350 = vmatpush3.bf16.msra.mxu0 %v349_v4  ;;  %v200_v13 = vld [vmem:[%s522_s3] sm:$0xff]  ;;  %122 = vrot.lane.b32.xlu0 %v302_v12, %s424_s21  ;;  %v203_v21 = vld [vmem:[%s522_s3 + $0x18] sm:$0xff]  ;;  %s293_s3 = sshll.u32 %s426_s25, 4  ;;  %vm282_vm3 = vcmp.lt.s32.totalorder %v281_v34, 8  ;;  %s294_s3 = int_to_ptr.vmem [resolvable:$true] %s293_s3 }
  0x17   :  { %353 = vmatpush3.bf16.msra.mxu1 %v352_v7  ;;  %357 = vmatprep.subr.bf16.mxu0 %v421_v0  ;;  %v358_v15 = vpack.c.bf16 %v201_v14, %v200_v13  ;;  %v361_v22 = vpack.c.bf16 %v203_v21, %v202_v20  ;;  %s394_s26 = scalar_lea.vmem %s294_s3, 128  ;;  %p399_p9 = scmp.lt.s32.totalorder %s294_s3, %s294_s3 }
  0x18   :  { %354 = vmatprep.subr.bf16.mxu1 %v421_v0  ;;  %p395_p8 = scmp.ne.s32.totalorder %s294_s3, %s394_s26  ;;  %p400_p10 = scmp.lt.s32.totalorder %s394_s26, %s394_s26 }
  0x19   :  { %324 = vmatmul.mubr.msk.f32.vlgmr.msra.gmra.mrb[0].mxu0 %vm43_vm1, %v33_v8 }
  0x1a   :  { %345 = vmatprep.mubr.msk.f32.mxu0 %vm422_vm0, %v423_v1  ;;  %359 = vmatpush3.bf16.msra.mxu0 %v358_v15  ;;  %p401_p11 = por %p400_p10, %p399_p9 }
  0x1b   :  { %356 = vmatpush3.bf16.msra.mxu1 %v355_v11  ;;  %360 = vmatprep.subr.bf16.mxu0 %v421_v0 }
  0x1c   :  { %204 = vrot.lane.b32.xlu0 %v302_v12, %s425_s24  ;;  %p402_p12 = pnand %p401_p11, %p395_p8 }
  0x1e   :  { %362 = vmatpush3.bf16.msra.mxu0 %v361_v22 }
  0x88   :  { %v123_v23 = vpop.permute.xlu0 %122 }
  0x8e   :  { %v205_v28 = vpop.permute.xlu0 %204 }
  0xec   :  { %v113_v16 = vpop.f32.mrb[0].mxu0 }
  0xed   :  { %v114_v17 = vadd.f32 %v302_v12, %v113_v16  ;;  %v325_v18 = vpop.f32.mrb[1].mxu0 }
  0xef   :  { %v117_v19 = vmax.f32 %v114_v17, 0.0 }
  0xf1   :  { %335 = vmatmul.mubr.msk.f32.vlgmr.msra.gmra.mrb[0].mxu1 %vm125_vm2, %v117_v19 }
 0x1c4   :  { %v195_v24 = vpop.f32.mrb[0].mxu1 }
 0x1c5   :  { %v196_v25 = vadd.f32 %v195_v24, %v123_v23  ;;  %v336_v26 = vpop.f32.mrb[1].mxu1 }
 0x1c7   :  { %v199_v27 = vmax.f32 %v196_v25, 0.0 }
 0x1c9   :  { %346 = vmatmul.mubr.msk.f32.vlgmr.msra.gmra.mrb[2].mxu0 %vm125_vm2, %v199_v27 }
 0x29c   :  { %v276_v29 = vpop.f32.mrb[2].mxu0 }
 0x29d   :  { %v277_v30 = vadd.f32 %v276_v29, %v205_v28  ;;  %v347_v31 = vpop.f32.mrb[3].mxu0 }
 0x29f   :  { %v283_v32 = vmul.f32 1.442695, %v277_v30 }
 0x2a1   :  { %370 = vpow2.f32 %v283_v32 }
 0x2ab   :  { %v371_v35 = vpop.eup %370 }
 0x2ac   :  { %v285_v36 = vsel %vm282_vm3, %v277_v30, %v371_v35 }
 0x2ad   :  { %286 = vst.msk [vmem:[#allocation5] sm:$0xff] %vm43_vm1, %v285_v36 }
 0x2ae   :  { %405 = shalt.err (!%p402_p12)
}
 0x2af   :  { %s406_s29 = scalar_lea.hbm %s524_s5, 128 }
 0x2b0   :  { %p407_p13 = scmp.ne.s32.totalorder %s524_s5, %s406_s29  ;;  %p410_p0 = scmp.lt.u32.totalorder %s406_s29, %s524_s5 }
 0x2b2   :  { %p412_p1 = pnand %p410_p0, %p407_p13 }
 0x2b4   :  { %415 = shalt.err (!%p412_p1)
}
 0x2b5   :  { %296 = dma.vmem_to_hbm [thread:$0]  %s294_s3, 128, %s524_s5, [#allocation4]  }
 0x2b6   :  { %418 = dma.done.wait [#allocation4], 128  }
 0x2b7   :  { %419 = vsyncadd [#allocation4], 4294967168 }
 0x2b8   :  { %300 = vsyncpa [#allocation3], 1 }
 0x2b9   :  { %301 = vsyncpa [#allocation4], 1 }

</bundles_post_ra>
